<compile_context>
chip_gen: v7x
topology: tpu7x:2x2x1
jax: 0.10.0
libtpu: 0.0.40
codegen_flags: <defaults>
</compile_context>

<pallas_src>
from functools import partial

import jax
import jax.numpy as jnp
from jax.experimental import pallas as pl
from jax.experimental.pallas import tpu as pltpu

_LANES = 128
_SUB = 8
_MAX_TILE_ROWS = 7168                  # keeps 8*tile + 2 MiB <= ~30 MiB VMEM
_FAST_PATH_BYTES = 3 << 20             # single-pass path for <= 3 MiB (f32)


def _fused_kernel(x_ref, o_ref):
    """Single-pass path: whole (rows,128) slab resident in VMEM."""
    x = x_ref[...].astype(jnp.float32)
    c = jnp.max(x)
    e = jnp.exp(x - c)                      # exp(-inf pad - c) == 0 exactly
    o_ref[...] = (e * (1.0 / jnp.sum(e))).astype(o_ref.dtype)


def _make_reduce_kernel(tile_r, inner_tiles, rows_valid, need_row_mask):
    """Pass 1: online per-(sublane,lane) max + rescaled sum(exp) accumulators.

    m_ref / s_ref are (1,8,128) output blocks whose index only depends on the
    outer ("parallel") core axis, so they stay resident in VMEM across the
    inner ("arbitrary") reduction axis and are written back once per core.
    """
    sub_tiles = tile_r // _SUB

    def kernel(x_ref, m_ref, s_ref):
        p = pl.program_id(0)
        t = pl.program_id(1)

        @pl.when(t == 0)
        def _init():
            m_ref[...] = jnp.full(m_ref.shape, -jnp.inf, dtype=jnp.float32)
            s_ref[...] = jnp.zeros(s_ref.shape, dtype=jnp.float32)

        x = x_ref[...].astype(jnp.float32)              # (tile_r, 128)
        if need_row_mask:
            # Mask rows past the logical end (ragged last tile / dummy tile of
            # the 2-way core split) using the UNCLAMPED logical row index.
            row0 = (p * inner_tiles + t) * tile_r
            rid = jax.lax.broadcasted_iota(jnp.int32, (tile_r, _LANES), 0) + row0
            x = jnp.where(rid < rows_valid, x, -jnp.inf)

        # (tile_r,128) -> (tile_r/8, 8, 128): layout no-op; reductions over
        # axis 0 are plain elementwise VPU ops across vregs (no XLU, no
        # sub-vreg masked stores on the accumulator path).
        x3 = x.reshape(sub_tiles, _SUB, _LANES)

        m_old = m_ref[...]                               # (1, 8, 128)
        m_new = jnp.maximum(m_old, jnp.max(x3, axis=0, keepdims=True))

        # Guard exp so -inf (padding / masked rows / genuine -inf inputs)
        # contributes exactly 0 instead of NaN when a whole column is -inf.
        e = jnp.where(x3 == -jnp.inf, 0.0, jnp.exp(x3 - m_new))
        s_tile = jnp.sum(e, axis=0, keepdims=True)       # (1, 8, 128)

        scale = jnp.where(m_old == -jnp.inf, 0.0, jnp.exp(m_old - m_new))
        s_ref[...] = s_ref[...] * scale + s_tile
        m_ref[...] = m_new

    return kernel


def _normalize_kernel(m_ref, s_ref, x_ref, o_ref):
    """Pass 2: merge the tiny (cores,8,128) partials once per tile (hidden
    under the tile DMA) and write exp(x - c) * (1/s), lane-dense."""
    m = m_ref[...]
    s = s_ref[...]
    c = jnp.max(m)                                       # global max
    w = jnp.where(m == -jnp.inf, 0.0, jnp.exp(m - c))
    inv = 1.0 / jnp.sum(s * w)                           # exact f32 divide
    x = x_ref[...].astype(jnp.float32)
    o_ref[...] = (jnp.exp(x - c) * inv).astype(o_ref.dtype)


@partial(jax.jit, static_argnames=("tile_rows", "fast_path_max_bytes"))
def softmax_stable(x: jax.Array, *, tile_rows: int = 4096,
                   fast_path_max_bytes: int = _FAST_PATH_BYTES) -> jax.Array:
    """Numerically-stable softmax over ALL elements of x (SoftmaxStable)."""
    orig_shape = x.shape
    orig_dtype = x.dtype
    n = int(x.size)

    # ---- lane-dense view: (rows, 128).  Zero-copy when n is 128-aligned. ----
    rows = -(-n // _LANES)
    padded_n = rows * _LANES
    needs_pad = padded_n != n
    if needs_pad:
        xf = jnp.ravel(x)
        xf = jnp.concatenate(
            [xf, jnp.full((padded_n - n,), -jnp.inf, dtype=xf.dtype)])
        x2d = xf.reshape(rows, _LANES)
    else:
        x2d = jnp.ravel(x).reshape(rows, _LANES)

    f32_bytes = rows * _LANES * 4

    if f32_bytes <= fast_path_max_bytes:
        # ---------------- single pass: everything resident in VMEM ----------
        y2d = pl.pallas_call(
            _fused_kernel,
            out_shape=jax.ShapeDtypeStruct((rows, _LANES), orig_dtype),
            grid=(1,),
            in_specs=[pl.BlockSpec((rows, _LANES), lambda i: (0, 0))],
            out_specs=pl.BlockSpec((rows, _LANES), lambda i: (0, 0)),
            compiler_params=pltpu.CompilerParams(
                dimension_semantics=("arbitrary",),
                vmem_limit_bytes=int(min(32 << 20, 8 * f32_bytes + (2 << 20)))),
        )(x2d)
    else:
        # ---------------- two-pass streaming path ----------------------------
        rows8 = -(-rows // _SUB) * _SUB
        tile_r = max(_SUB, min(int(tile_rows), _MAX_TILE_ROWS))
        tile_r -= tile_r % _SUB
        tile_r = min(tile_r, rows8)
        tile_f32 = tile_r * _LANES * 4
        # Declared limit always covers the double-buffered working set.
        vmem_limit = int(8 * tile_f32 + (2 << 20))

        nb = -(-rows // tile_r)                 # number of row tiles
        n_split = 2 if nb >= 2 else 1           # per-core accumulators (v7x)
        inner = -(-nb // n_split)
        need_row_mask = (nb * tile_r != rows) or (n_split * inner != nb)

        if n_split * inner == nb:
            x_map = lambda p, t: (p * inner + t, 0)
        else:  # clamp the dummy tail tile; its rows are fully masked in-kernel
            x_map = lambda p, t: (jnp.minimum(p * inner + t, nb - 1), 0)

        # pass 1: per-core (8,128) running max / rescaled running sum(exp)
        m_lanes, s_lanes = pl.pallas_call(
            _make_reduce_kernel(tile_r, inner, rows, need_row_mask),
            out_shape=(
                jax.ShapeDtypeStruct((n_split, _SUB, _LANES), jnp.float32),
                jax.ShapeDtypeStruct((n_split, _SUB, _LANES), jnp.float32)),
            grid=(n_split, inner),
            in_specs=[pl.BlockSpec((tile_r, _LANES), x_map)],
            out_specs=(
                pl.BlockSpec((1, _SUB, _LANES), lambda p, t: (p, 0, 0)),
                pl.BlockSpec((1, _SUB, _LANES), lambda p, t: (p, 0, 0))),
            compiler_params=pltpu.CompilerParams(
                dimension_semantics=("parallel", "arbitrary"),
                vmem_limit_bytes=vmem_limit),
        )(x2d)

        # pass 2: y = exp(x - c) * (1/s), partials merged in-kernel
        y2d = pl.pallas_call(
            _normalize_kernel,
            out_shape=jax.ShapeDtypeStruct((rows, _LANES), orig_dtype),
            grid=(nb,),
            in_specs=[
                pl.BlockSpec((n_split, _SUB, _LANES), lambda i: (0, 0, 0)),
                pl.BlockSpec((n_split, _SUB, _LANES), lambda i: (0, 0, 0)),
                pl.BlockSpec((tile_r, _LANES), lambda i: (i, 0))],
            out_specs=pl.BlockSpec((tile_r, _LANES), lambda i: (i, 0)),
            compiler_params=pltpu.CompilerParams(
                dimension_semantics=("parallel",),
                vmem_limit_bytes=vmem_limit),
        )(m_lanes, s_lanes, x2d)

    if needs_pad:
        return y2d.reshape(-1)[:n].reshape(orig_shape)
    return y2d.reshape(orig_shape)


if __name__ == "__main__":
    key = jax.random.PRNGKey(0)

    # Small shape consistent with the module (seq=8, hidden=32) -> fast path.
    x = jax.random.normal(key, (8, 32), dtype=jnp.float32)
    y = jax.block_until_ready(softmax_stable(x))
    c = jnp.max(x)
    e = jnp.exp(x - c)
    y_ref = e / jnp.sum(e)
    assert y.shape == x.shape and y.dtype == x.dtype
    assert jnp.allclose(y, y_ref, atol=1e-6, rtol=1e-6)
    assert jnp.allclose(jnp.sum(y), 1.0, atol=1e-5)

    # Force the tiled two-pass path: non-128-aligned size, ragged last tile,
    # and a clamped dummy tile on the 2-way core split.
    x2 = jax.random.normal(jax.random.PRNGKey(1), (300, 200), dtype=jnp.float32)
    y2 = jax.block_until_ready(
        softmax_stable(x2, tile_rows=96, fast_path_max_bytes=0))
    c2 = jnp.max(x2)
    e2 = jnp.exp(x2 - c2)
    y2_ref = e2 / jnp.sum(e2)
    assert jnp.allclose(y2, y2_ref, atol=1e-8, rtol=2e-5)
    assert jnp.allclose(jnp.sum(y2), 1.0, atol=1e-4)

    # 128-aligned two-pass path (zero-copy repack, no padding, ragged tile).
    x3 = jax.random.normal(jax.random.PRNGKey(2), (512, 128), dtype=jnp.float32)
    y3 = jax.block_until_ready(
        softmax_stable(x3, tile_rows=96, fast_path_max_bytes=0))
    c3 = jnp.max(x3)
    e3 = jnp.exp(x3 - c3)
    y3_ref = e3 / jnp.sum(e3)
    assert jnp.allclose(y3, y3_ref, atol=1e-8, rtol=2e-5)
    assert jnp.allclose(jnp.sum(y3), 1.0, atol=1e-4)

    print("KERNEL_OK")
</pallas_src>

<mosaic_0001>
module attributes {stable_mosaic.version = 11 : i64} {
  func.func @_fused_kernel(%arg0: i32, %arg1: memref<2x128xf32, #tpu.memory_space<vmem>>, %arg2: memref<2x128xf32, #tpu.memory_space<vmem>>) attributes {dimension_semantics = [#tpu.dimension_semantics<arbitrary>], iteration_bounds = array<i64: 1>, scalar_prefetch = 0 : i64, scratch_operands = 0 : i64, tpu.core_type = #tpu.core_type<tc>, window_params = [{pipeline_mode = #tpu.pipeline_mode<synchronous>, transform_indices = @transform_0, window_bounds = array<i64: 2, 128>}, {pipeline_mode = #tpu.pipeline_mode<synchronous>, transform_indices = @transform_1, window_bounds = array<i64: 2, 128>}]} {
    %c0 = arith.constant 0 : index
    %c0_0 = arith.constant 0 : index
    %0 = vector.load %arg1[%c0, %c0_0] : memref<2x128xf32, #tpu.memory_space<vmem>>, vector<2x128xf32>
    %1 = vector.shape_cast %0 : vector<2x128xf32> to vector<1x2x128xf32>
    %cst = arith.constant dense<0xFF800000> : vector<1xf32>
    %2 = vector.multi_reduction <maximumf>, %1, %cst [1, 2] : vector<1x2x128xf32> to vector<1xf32>
    %3 = vector.shape_cast %2 : vector<1xf32> to vector<1x1x1xf32>
    %4 = vector.extract %3[0, 0, 0] : f32 from vector<1x1x1xf32>
    %5 = vector.broadcast %4 : f32 to vector<2x128xf32>
    %6 = arith.subf %0, %5 : vector<2x128xf32>
    %7 = math.exp %6 : vector<2x128xf32>
    %8 = vector.shape_cast %7 : vector<2x128xf32> to vector<1x2x128xf32>
    %cst_1 = arith.constant dense<0.000000e+00> : vector<1xf32>
    %9 = vector.multi_reduction <add>, %8, %cst_1 [1, 2] : vector<1x2x128xf32> to vector<1xf32>
    %10 = vector.shape_cast %9 : vector<1xf32> to vector<1x1x1xf32>
    %11 = vector.extract %10[0, 0, 0] : f32 from vector<1x1x1xf32>
    %cst_2 = arith.constant 1.000000e+00 : f32
    %12 = arith.divf %cst_2, %11 : f32
    %13 = vector.broadcast %12 : f32 to vector<2x128xf32>
    %14 = arith.mulf %7, %13 : vector<2x128xf32>
    %c0_3 = arith.constant 0 : index
    %c0_4 = arith.constant 0 : index
    %15 = vector.load %arg2[%c0_3, %c0_4] : memref<2x128xf32, #tpu.memory_space<vmem>>, vector<2x128xf32>
    tpu.vector_store %arg2[%c0_3, %c0_4], %14 {strides = array<i32>} : memref<2x128xf32, #tpu.memory_space<vmem>>, vector<2x128xf32>,
    return
  }
  func.func @transform_0(%arg0: i32) -> (i32, i32) {
    %c0_i32 = arith.constant 0 : i32
    %c0_i32_0 = arith.constant 0 : i32
    %c0_i32_1 = arith.constant 0 : i32
    return %c0_i32, %c0_i32_0 : i32, i32
  }
  func.func @transform_1(%arg0: i32) -> (i32, i32) {
    %c0_i32 = arith.constant 0 : i32
    %c0_i32_0 = arith.constant 0 : i32
    %c0_i32_1 = arith.constant 0 : i32
    return %c0_i32, %c0_i32_0 : i32, i32
  }
}

</mosaic_0001>

<bundles_post_ra>
// kernel: softmax_stable.1
= control target key start
LH: loop header
LB: loop body
LE: loop exit
PB: predicated region body
PF: predicated region fallthrough
CT: control target
= control target key end

     0   :  { %vm9_vm0 = vcmask 1041408   ;;  %s72_s0 = inlined_call_operand.vmem [shape: f32[2,128], index: 0, kind: input, shape index: {}]   ;;  %s73_s1 = inlined_call_operand.vmem [shape: f32[2,128], index: 1, kind: output, shape index: {}]  }
   0x1   :  { %v8_v0 = vld [vmem:[%s72_s0] sm:$0x3] }
   0x2   :  { %v10_v1 = vsel %vm9_vm0, %v8_v0, -inf }
   0x3   :  { %11 = vmax.xlane.f32.xlu0 %v10_v1 }
  0x90   :  { %v12_v2 = vpop.xlane.xlu0 %11 }
  0x91   :  { %v13_v3 = vrot.slane %v12_v2, 4 }
  0x93   :  { %v14_v4 = vmax.f32 %v12_v2, %v13_v3 }
  0x95   :  { %v15_v5 = vrot.slane %v14_v4, 2 }
  0x97   :  { %v16_v6 = vmax.f32 %v14_v4, %v15_v5 }
  0x99   :  { %v17_v7 = vrot.slane %v16_v6, 1 }
  0x9b   :  { %v18_v8 = vmax.f32 %v16_v6, %v17_v7 }
  0x9d   :  { %44 = vpush %v18_v8 }
  0xce   :  { %s45_s8 = spop %44 }
  0xcf   :  { %v20_v9 = vstv %s45_s8 }
  0xd0   :  { %v21_v10 = vsub.f32 %v8_v0, %v20_v9 }
  0xd2   :  { %v22_v11 = vmul.f32 1.442695, %v21_v10 }
  0xd4   :  { %50 = vpow2.f32 %v22_v11 }
  0xde   :  { %v51_v12 = vpop.eup %50 }
  0xdf   :  { %v24_v13 = vsel %vm9_vm0, %v51_v12, 0.0 }
  0xe0   :  { %25 = vadd.xlane.f32.xlu0 %v24_v13 }
 0x16d   :  { %v26_v14 = vpop.xlane.xlu0 %25 }
 0x16e   :  { %v27_v15 = vrot.slane %v26_v14, 4 }
 0x170   :  { %v28_v16 = vadd.f32 %v27_v15, %v26_v14 }
 0x172   :  { %v29_v17 = vrot.slane %v28_v16, 2 }
 0x174   :  { %v30_v18 = vadd.f32 %v29_v17, %v28_v16 }
 0x176   :  { %v31_v19 = vrot.slane %v30_v18, 1 }
 0x178   :  { %v32_v20 = vadd.f32 %v31_v19, %v30_v18 }
 0x17a   :  { %46 = vpush %v32_v20 }
 0x1ab   :  { %s47_s0 = spop %46 }
 0x1ac   :  { %v34_v21 = vstv %s47_s0 }
 0x1ad   :  { %52 = vrcp.f32 %v34_v21 }
 0x1b7   :  { %v53_v22 = vpop.eup %52 }
 0x1b8   :  { %48 = vpush %v53_v22 }
 0x1e9   :  { %s49_s9 = spop %48 }
 0x1ea   :  { %v37_v23 = vstv %s49_s9 }
 0x1eb   :  { %v38_v24 = vmul.f32 %v51_v12, %v37_v23 }
 0x1ed   :  { %39 = vst [vmem:[%s73_s1] sm:$0x3] %v38_v24 }

</bundles_post_ra>
